<compile_context>
chip_gen: v6e
topology: v6e:2x2x1
jax: 0.10.0
libtpu: 0.0.40
codegen_flags: <defaults>
</compile_context>

<pallas_src>
from functools import partial

import numpy as np
import jax
import jax.numpy as jnp
from jax.experimental import pallas as pl
from jax.experimental.pallas import tpu as pltpu

EMBEDDING_SIZE = 100
HIDDEN_SIZE = 16
NUM_CLASSES = 2
BATCH = 2
SEQ = 8          # pyramid: 8 -> 4 -> 2
OUT_LANES = 128  # lane-dense output / head width


# ---------------------------------------------------------------------------
# Static pyramid structure (mirrors torch's `while x.size(2) > 2`).
# ---------------------------------------------------------------------------
def _pyramid_levels(S):
    # The head's .view(B, 2*hidden) requires the final height to be exactly 2.
    levels = [(S, 1)]
    H, d = S, 1
    while H > 2:
        H = (H - 2) // 2 + 1     # pad-bottom(1) + MaxPool((3,1), stride=2)
        d *= 2
        levels.append((H, d))
    assert levels[-1][0] == 2, f"sequence length {S} does not reduce to height 2"
    return levels


# ---------------------------------------------------------------------------
# Kernel factory (all sizes are static Python ints).
# ---------------------------------------------------------------------------
def make_dpcnn_kernel(B, S, C, E):
    levels = _pyramid_levels(S)          # [(height, row stride), ...], last height == 2
    Hp = S + 2
    R = B * Hp

    def kernel(xpad_ref, masks_ref, wr_ref, br_ref, wc_ref, bc_ref,
               wl_ref, bl_ref, o_ref):
        # xpad_ref : (R, E)   f32  zero-padded input slab (pad rows already zero)
        # masks_ref: (R, L)   f32  per-level active-row masks (numpy-built constants)
        # wr_ref   : (3E, C)  bf16 region conv weight, taps folded into K
        # br_ref   : (1, C)   f32
        # wc_ref   : (3C, C)  bf16 (3,1)-conv weight, taps folded into K
        # bc_ref   : (1, C)   f32
        # wl_ref   : (2C,128) bf16 linear head, lane-dense padded
        # bl_ref   : (1, 128) f32  head bias, -1e30 in pad lanes
        # o_ref    : (B, 128) f32  softmax probs in columns [0, N)
        wc = wc_ref[...]
        bc = bc_ref[...]
        masks = masks_ref[...]                                       # (R, L)

        def conv(P, d, m):
            # pad(1) -> ReLU -> Conv2d(C, C, (3,1)) at row stride d on the fixed slab.
            # P is masked (zero off this level's active rows), so out-of-range and
            # cross-batch taps read exact zeros.
            a = jnp.maximum(P, 0.0)
            z = jnp.zeros((d, C), jnp.float32)
            ae = jnp.concatenate([z, a, z], axis=0)                  # (R+2d, C)
            a3 = jnp.concatenate(
                [ae[0:R], ae[d:R + d], ae[2 * d:R + 2 * d]], axis=1)  # (R, 3C)
            y = jnp.dot(a3.astype(jnp.bfloat16), wc,
                        preferred_element_type=jnp.float32) + bc     # (R, C)
            return y * m                                             # keep active rows

        # ---- region embedding: in-kernel im2col (3 taps folded into K=3E), 1 matmul
        m0 = masks[:, 0:1]
        x = xpad_ref[...]                                            # (R, E)
        ze = jnp.zeros((1, E), jnp.float32)
        xe = jnp.concatenate([ze, x, ze], axis=0)                    # (R+2, E)
        x3 = jnp.concatenate([xe[0:R], xe[1:R + 1], xe[2:R + 2]], axis=1)  # (R, 3E)
        P = (jnp.dot(x3.astype(jnp.bfloat16), wr_ref[...],
                     preferred_element_type=jnp.float32) + br_ref[...]) * m0

        # ---- two conv layers at stride 1
        P = conv(P, 1, m0)
        P = conv(P, 1, m0)

        # ---- pyramid (static python loop -> fully unrolled at trace time)
        for lvl in range(1, len(levels)):
            dp = levels[lvl - 1][1]          # row stride of the level being pooled
            d = levels[lvl][1]               # row stride after pooling (= 2*dp)
            m = masks[:, lvl:lvl + 1]
            # pad-bottom + MaxPool((3,1), stride=2): shifted slices + 2 maxima;
            # the stride-2 downselect is just the constant mask (no gather / matmul).
            zp = jnp.zeros((2 * dp, C), jnp.float32)
            pe = jnp.concatenate([P, zp], axis=0)
            mx = jnp.maximum(jnp.maximum(pe[0:R], pe[dp:R + dp]),
                             pe[2 * dp:R + 2 * dp])
            pre = mx * m                     # pooled values live on the new active rows
            t = conv(pre, d, m)
            t = conv(t, d, m)
            P = t + pre                      # residual (inactive rows stay 0)

        # ---- head: gather the two surviving rows per batch, linear, softmax
        dL = levels[-1][1]
        rows_h0 = jnp.concatenate(
            [P[b * Hp + 1: b * Hp + 2] for b in range(B)], axis=0)            # (B, C)
        rows_h1 = jnp.concatenate(
            [P[b * Hp + 1 + dL: b * Hp + 2 + dL] for b in range(B)], axis=0)  # (B, C)
        feat = jnp.concatenate([rows_h0, rows_h1], axis=1).astype(jnp.bfloat16)  # (B, 2C)
        logits = jnp.dot(feat, wl_ref[...],
                         preferred_element_type=jnp.float32) + bl_ref[...]    # (B, 128)

        mmax = jnp.max(logits, axis=1, keepdims=True)
        e = jnp.exp(logits - mmax)           # pad lanes: exp(-1e30 - max) == 0 exactly
        s = jnp.sum(e, axis=1, keepdims=True)
        o_ref[...] = e * pl.reciprocal(s, approx=True)   # full-lane unmasked store

    return kernel


# ---------------------------------------------------------------------------
# One-time parameter / mask rearrangement (hoisted out of the per-forward path).
# ---------------------------------------------------------------------------
def make_dpcnn_params(Wr, br, Wc, bc, Wl, bl, *, batch=BATCH, seq=SEQ):
    C, _, _, E = Wr.shape
    N = Wl.shape[0]
    # region conv: wr3[k*E + e, c] = Wr[c, 0, k, e]
    wr3 = Wr[:, 0].reshape(C, 3 * E).T.astype(jnp.bfloat16)                    # (3E, C)
    # (3,1) conv: wc3[k*C + ci, co] = Wc[co, ci, k, 0]
    wc3 = jnp.transpose(Wc[:, :, :, 0], (2, 1, 0)).reshape(3 * C, C).astype(jnp.bfloat16)
    # linear head, lane-dense: torch flat index j = 2*c + h -> feature column h*C + c,
    # padded to 128 lanes (bias pad = -1e30 so the 128-wide softmax is exact in [0, N)).
    wl2 = jnp.transpose(Wl.T.reshape(C, 2, N), (1, 0, 2)).reshape(2 * C, N)
    wl128 = jnp.zeros((2 * C, OUT_LANES), jnp.bfloat16).at[:, :N].set(
        wl2.astype(jnp.bfloat16))
    bl128 = jnp.full((1, OUT_LANES), -1e30, jnp.float32).at[:, :N].set(
        bl.astype(jnp.float32))
    # per-level active-row masks, built once with numpy (no in-kernel iota/mod chains)
    levels = _pyramid_levels(seq)
    Hp = seq + 2
    m = np.zeros((batch * Hp, len(levels)), np.float32)
    for l, (H, d) in enumerate(levels):
        for b in range(batch):
            for i in range(H):
                m[b * Hp + 1 + d * i, l] = 1.0
    return dict(
        wr3=wr3, br=br.reshape(1, C).astype(jnp.float32),
        wc3=wc3, bc=bc.reshape(1, C).astype(jnp.float32),
        wl=wl128, bl=bl128, masks=jnp.asarray(m))


# ---------------------------------------------------------------------------
# Forward wrapper: only pad+reshape on the wrapper side, then one pallas_call.
# ---------------------------------------------------------------------------
@partial(jax.jit, static_argnames=("num_classes",))
def dpcnn_forward(x, params, *, num_classes=NUM_CLASSES):
    B, S, E = x.shape
    C = params["wc3"].shape[1]
    xpad = jnp.pad(x, ((0, 0), (1, 1), (0, 0))).reshape(B * (S + 2), E)  # (R, E) f32

    vmem = pl.BlockSpec(memory_space=pltpu.MemorySpace.VMEM)
    out = pl.pallas_call(
        make_dpcnn_kernel(B, S, C, E),
        out_shape=jax.ShapeDtypeStruct((B, OUT_LANES), jnp.float32),
        in_specs=[vmem] * 8,
        out_specs=vmem,
    )(xpad, params["masks"], params["wr3"], params["br"], params["wc3"],
      params["bc"], params["wl"], params["bl"])
    return out[:, :num_classes]


# ---------------------------------------------------------------------------
# Pure-JAX reference mirroring the PyTorch NCHW semantics (for verification).
# ---------------------------------------------------------------------------
def dpcnn_reference(x, Wr, br, Wc, bc, Wl, bl):
    B, S, E = x.shape
    C = Wr.shape[0]

    h = jnp.pad(x[:, None, :, :], ((0, 0), (0, 0), (1, 1), (0, 0)))  # (B,1,S+2,E)
    win = jnp.stack([h[:, 0, k:k + S, :] for k in range(3)], axis=1)  # (B,3,S,E)
    h = jnp.einsum('bkse,cke->bcs', win, Wr[:, 0]) + br[None, :, None]  # (B,C,S)

    def pad_relu_conv(a):  # a: (B, C, H)
        H = a.shape[2]
        ap = jnp.maximum(jnp.pad(a, ((0, 0), (0, 0), (1, 1))), 0.0)
        w = jnp.stack([ap[:, :, k:k + H] for k in range(3)], axis=2)  # (B,C,3,H)
        return jnp.einsum('bikh,oik->boh', w, Wc[:, :, :, 0]) + bc[None, :, None]

    h = pad_relu_conv(h)
    h = pad_relu_conv(h)
    while h.shape[2] > 2:
        hp = jnp.pad(h, ((0, 0), (0, 0), (0, 1)))
        Ho = (hp.shape[2] - 3) // 2 + 1
        pre = jnp.stack([jnp.max(hp[:, :, 2 * i:2 * i + 3], axis=2)
                         for i in range(Ho)], axis=2)
        t = pad_relu_conv(pre)
        t = pad_relu_conv(t)
        h = t + pre
    flat = h.reshape(B, 2 * C)            # matches torch .view (index = 2*c + h)
    logits = flat @ Wl.T + bl
    return jax.nn.softmax(logits, axis=1)


if __name__ == "__main__":
    key = jax.random.PRNGKey(0)
    kx, k1, k2, k3, k4, k5, k6 = jax.random.split(key, 7)

    C, E, N = HIDDEN_SIZE, EMBEDDING_SIZE, NUM_CLASSES
    x = jax.random.normal(kx, (BATCH, SEQ, E), jnp.float32)
    Wr = jax.random.normal(k1, (C, 1, 3, E), jnp.float32) * 0.05   # Conv2d(1, C, (3, E))
    br = jax.random.normal(k2, (C,), jnp.float32) * 0.05
    Wc = jax.random.normal(k3, (C, C, 3, 1), jnp.float32) * 0.05   # Conv2d(C, C, (3, 1))
    bc = jax.random.normal(k4, (C,), jnp.float32) * 0.05
    Wl = jax.random.normal(k5, (N, 2 * C), jnp.float32) * 0.05     # Linear(2C, N)
    bl = jax.random.normal(k6, (N,), jnp.float32) * 0.05

    # weight / mask rearrangement done ONCE (not in the per-call path)
    params = make_dpcnn_params(Wr, br, Wc, bc, Wl, bl)
    params = jax.tree_util.tree_map(jax.block_until_ready, params)

    out = dpcnn_forward(x, params)
    out = jax.block_until_ready(out)

    ref = dpcnn_reference(x, Wr, br, Wc, bc, Wl, bl)
    assert out.shape == (BATCH, NUM_CLASSES)
    # bf16 MXU inputs + approx reciprocal -> relaxed tolerance vs f32 reference
    assert jnp.allclose(out, ref, atol=2e-2, rtol=2e-2), (out, ref)

    print("KERNEL_OK")
</pallas_src>

<mosaic_0001>
module attributes {stable_mosaic.version = 11 : i64} {
  func.func @kernel(%arg0: memref<20x100xf32, #tpu.memory_space<vmem>>, %arg1: memref<20x3xf32, #tpu.memory_space<vmem>>, %arg2: memref<300x16xbf16, #tpu.memory_space<vmem>>, %arg3: memref<1x16xf32, #tpu.memory_space<vmem>>, %arg4: memref<48x16xbf16, #tpu.memory_space<vmem>>, %arg5: memref<1x16xf32, #tpu.memory_space<vmem>>, %arg6: memref<32x128xbf16, #tpu.memory_space<vmem>>, %arg7: memref<1x128xf32, #tpu.memory_space<vmem>>, %arg8: memref<2x128xf32, #tpu.memory_space<vmem>>) attributes {dimension_semantics = [], scalar_prefetch = 0 : i64, scratch_operands = 0 : i64, tpu.core_type = #tpu.core_type<tc>} {
    %c0 = arith.constant 0 : index
    %c0_0 = arith.constant 0 : index
    %0 = vector.load %arg4[%c0, %c0_0] : memref<48x16xbf16, #tpu.memory_space<vmem>>, vector<48x16xbf16>
    %c0_1 = arith.constant 0 : index
    %c0_2 = arith.constant 0 : index
    %1 = vector.load %arg5[%c0_1, %c0_2] : memref<1x16xf32, #tpu.memory_space<vmem>>, vector<1x16xf32>
    %c0_3 = arith.constant 0 : index
    %c0_4 = arith.constant 0 : index
    %2 = vector.load %arg1[%c0_3, %c0_4] : memref<20x3xf32, #tpu.memory_space<vmem>>, vector<20x3xf32>
    %3 = vector.extract_strided_slice %2 {offsets = [0, 0], sizes = [20, 1], strides = [1, 1]} : vector<20x3xf32> to vector<20x1xf32>
    %c0_5 = arith.constant 0 : index
    %c0_6 = arith.constant 0 : index
    %4 = vector.load %arg0[%c0_5, %c0_6] : memref<20x100xf32, #tpu.memory_space<vmem>>, vector<20x100xf32>
    %cst = arith.constant 0.000000e+00 : f32
    %5 = vector.broadcast %cst : f32 to vector<1x100xf32>
    %6 = tpu.concatenate %5, %4, %5 in 0 : vector<1x100xf32>, vector<20x100xf32>, vector<1x100xf32> -> vector<22x100xf32>
    %7 = vector.extract_strided_slice %6 {offsets = [0, 0], sizes = [20, 100], strides = [1, 1]} : vector<22x100xf32> to vector<20x100xf32>
    %8 = vector.extract_strided_slice %6 {offsets = [1, 0], sizes = [20, 100], strides = [1, 1]} : vector<22x100xf32> to vector<20x100xf32>
    %9 = vector.extract_strided_slice %6 {offsets = [2, 0], sizes = [20, 100], strides = [1, 1]} : vector<22x100xf32> to vector<20x100xf32>
    %10 = tpu.concatenate %7, %8, %9 in 1 : vector<20x100xf32>, vector<20x100xf32>, vector<20x100xf32> -> vector<20x300xf32>
    %11 = arith.truncf %10 : vector<20x300xf32> to vector<20x300xbf16>
    %c0_7 = arith.constant 0 : index
    %c0_8 = arith.constant 0 : index
    %12 = vector.load %arg2[%c0_7, %c0_8] : memref<300x16xbf16, #tpu.memory_space<vmem>>, vector<300x16xbf16>
    %cst_9 = arith.constant dense<0.000000e+00> : vector<20x16xf32>
    %13 = tpu.matmul %11, %12, %cst_9 {dimension_numbers = #tpu.dot_dimension_numbers<[1], [0], [0], [1], [0, 0, 1, 1], [], []>} : vector<20x300xbf16>, vector<300x16xbf16>, vector<20x16xf32> -> vector<20x16xf32>
    %c0_10 = arith.constant 0 : index
    %c0_11 = arith.constant 0 : index
    %14 = vector.load %arg3[%c0_10, %c0_11] : memref<1x16xf32, #tpu.memory_space<vmem>>, vector<1x16xf32>
    %15 = vector.broadcast %14 : vector<1x16xf32> to vector<20x16xf32>
    %16 = arith.addf %13, %15 : vector<20x16xf32>
    %17 = vector.broadcast %3 : vector<20x1xf32> to vector<20x16xf32>
    %18 = arith.mulf %16, %17 : vector<20x16xf32>
    %cst_12 = arith.constant 0.000000e+00 : f32
    %19 = vector.broadcast %cst_12 : f32 to vector<20x16xf32>
    %20 = arith.maximumf %18, %19 : vector<20x16xf32>
    %cst_13 = arith.constant 0.000000e+00 : f32
    %21 = vector.broadcast %cst_13 : f32 to vector<1x16xf32>
    %22 = tpu.concatenate %21, %20, %21 in 0 : vector<1x16xf32>, vector<20x16xf32>, vector<1x16xf32> -> vector<22x16xf32>
    %23 = vector.extract_strided_slice %22 {offsets = [0, 0], sizes = [20, 16], strides = [1, 1]} : vector<22x16xf32> to vector<20x16xf32>
    %24 = vector.extract_strided_slice %22 {offsets = [1, 0], sizes = [20, 16], strides = [1, 1]} : vector<22x16xf32> to vector<20x16xf32>
    %25 = vector.extract_strided_slice %22 {offsets = [2, 0], sizes = [20, 16], strides = [1, 1]} : vector<22x16xf32> to vector<20x16xf32>
    %26 = tpu.concatenate %23, %24, %25 in 1 : vector<20x16xf32>, vector<20x16xf32>, vector<20x16xf32> -> vector<20x48xf32>
    %27 = arith.truncf %26 : vector<20x48xf32> to vector<20x48xbf16>
    %cst_14 = arith.constant dense<0.000000e+00> : vector<20x16xf32>
    %28 = tpu.matmul %27, %0, %cst_14 {dimension_numbers = #tpu.dot_dimension_numbers<[1], [0], [0], [1], [0, 0, 1, 1], [], []>} : vector<20x48xbf16>, vector<48x16xbf16>, vector<20x16xf32> -> vector<20x16xf32>
    %29 = vector.broadcast %1 : vector<1x16xf32> to vector<20x16xf32>
    %30 = arith.addf %28, %29 : vector<20x16xf32>
    %31 = vector.broadcast %3 : vector<20x1xf32> to vector<20x16xf32>
    %32 = arith.mulf %30, %31 : vector<20x16xf32>
    %cst_15 = arith.constant 0.000000e+00 : f32
    %33 = vector.broadcast %cst_15 : f32 to vector<20x16xf32>
    %34 = arith.maximumf %32, %33 : vector<20x16xf32>
    %cst_16 = arith.constant 0.000000e+00 : f32
    %35 = vector.broadcast %cst_16 : f32 to vector<1x16xf32>
    %36 = tpu.concatenate %35, %34, %35 in 0 : vector<1x16xf32>, vector<20x16xf32>, vector<1x16xf32> -> vector<22x16xf32>
    %37 = vector.extract_strided_slice %36 {offsets = [0, 0], sizes = [20, 16], strides = [1, 1]} : vector<22x16xf32> to vector<20x16xf32>
    %38 = vector.extract_strided_slice %36 {offsets = [1, 0], sizes = [20, 16], strides = [1, 1]} : vector<22x16xf32> to vector<20x16xf32>
    %39 = vector.extract_strided_slice %36 {offsets = [2, 0], sizes = [20, 16], strides = [1, 1]} : vector<22x16xf32> to vector<20x16xf32>
    %40 = tpu.concatenate %37, %38, %39 in 1 : vector<20x16xf32>, vector<20x16xf32>, vector<20x16xf32> -> vector<20x48xf32>
    %41 = arith.truncf %40 : vector<20x48xf32> to vector<20x48xbf16>
    %cst_17 = arith.constant dense<0.000000e+00> : vector<20x16xf32>
    %42 = tpu.matmul %41, %0, %cst_17 {dimension_numbers = #tpu.dot_dimension_numbers<[1], [0], [0], [1], [0, 0, 1, 1], [], []>} : vector<20x48xbf16>, vector<48x16xbf16>, vector<20x16xf32> -> vector<20x16xf32>
    %43 = vector.broadcast %1 : vector<1x16xf32> to vector<20x16xf32>
    %44 = arith.addf %42, %43 : vector<20x16xf32>
    %45 = vector.broadcast %3 : vector<20x1xf32> to vector<20x16xf32>
    %46 = arith.mulf %44, %45 : vector<20x16xf32>
    %47 = vector.extract_strided_slice %2 {offsets = [0, 1], sizes = [20, 1], strides = [1, 1]} : vector<20x3xf32> to vector<20x1xf32>
    %cst_18 = arith.constant 0.000000e+00 : f32
    %48 = vector.broadcast %cst_18 : f32 to vector<2x16xf32>
    %49 = tpu.concatenate %46, %48 in 0 : vector<20x16xf32>, vector<2x16xf32> -> vector<22x16xf32>
    %50 = vector.extract_strided_slice %49 {offsets = [0, 0], sizes = [20, 16], strides = [1, 1]} : vector<22x16xf32> to vector<20x16xf32>
    %51 = vector.extract_strided_slice %49 {offsets = [1, 0], sizes = [20, 16], strides = [1, 1]} : vector<22x16xf32> to vector<20x16xf32>
    %52 = arith.maximumf %50, %51 : vector<20x16xf32>
    %53 = vector.extract_strided_slice %49 {offsets = [2, 0], sizes = [20, 16], strides = [1, 1]} : vector<22x16xf32> to vector<20x16xf32>
    %54 = arith.maximumf %52, %53 : vector<20x16xf32>
    %55 = vector.broadcast %47 : vector<20x1xf32> to vector<20x16xf32>
    %56 = arith.mulf %54, %55 : vector<20x16xf32>
    %cst_19 = arith.constant 0.000000e+00 : f32
    %57 = vector.broadcast %cst_19 : f32 to vector<20x16xf32>
    %58 = arith.maximumf %56, %57 : vector<20x16xf32>
    %cst_20 = arith.constant 0.000000e+00 : f32
    %59 = vector.broadcast %cst_20 : f32 to vector<2x16xf32>
    %60 = tpu.concatenate %59, %58, %59 in 0 : vector<2x16xf32>, vector<20x16xf32>, vector<2x16xf32> -> vector<24x16xf32>
    %61 = vector.extract_strided_slice %60 {offsets = [0, 0], sizes = [20, 16], strides = [1, 1]} : vector<24x16xf32> to vector<20x16xf32>
    %62 = vector.extract_strided_slice %60 {offsets = [2, 0], sizes = [20, 16], strides = [1, 1]} : vector<24x16xf32> to vector<20x16xf32>
    %63 = vector.extract_strided_slice %60 {offsets = [4, 0], sizes = [20, 16], strides = [1, 1]} : vector<24x16xf32> to vector<20x16xf32>
    %64 = tpu.concatenate %61, %62, %63 in 1 : vector<20x16xf32>, vector<20x16xf32>, vector<20x16xf32> -> vector<20x48xf32>
    %65 = arith.truncf %64 : vector<20x48xf32> to vector<20x48xbf16>
    %cst_21 = arith.constant dense<0.000000e+00> : vector<20x16xf32>
    %66 = tpu.matmul %65, %0, %cst_21 {dimension_numbers = #tpu.dot_dimension_numbers<[1], [0], [0], [1], [0, 0, 1, 1], [], []>} : vector<20x48xbf16>, vector<48x16xbf16>, vector<20x16xf32> -> vector<20x16xf32>
    %67 = vector.broadcast %1 : vector<1x16xf32> to vector<20x16xf32>
    %68 = arith.addf %66, %67 : vector<20x16xf32>
    %69 = vector.broadcast %47 : vector<20x1xf32> to vector<20x16xf32>
    %70 = arith.mulf %68, %69 : vector<20x16xf32>
    %cst_22 = arith.constant 0.000000e+00 : f32
    %71 = vector.broadcast %cst_22 : f32 to vector<20x16xf32>
    %72 = arith.maximumf %70, %71 : vector<20x16xf32>
    %cst_23 = arith.constant 0.000000e+00 : f32
    %73 = vector.broadcast %cst_23 : f32 to vector<2x16xf32>
    %74 = tpu.concatenate %73, %72, %73 in 0 : vector<2x16xf32>, vector<20x16xf32>, vector<2x16xf32> -> vector<24x16xf32>
    %75 = vector.extract_strided_slice %74 {offsets = [0, 0], sizes = [20, 16], strides = [1, 1]} : vector<24x16xf32> to vector<20x16xf32>
    %76 = vector.extract_strided_slice %74 {offsets = [2, 0], sizes = [20, 16], strides = [1, 1]} : vector<24x16xf32> to vector<20x16xf32>
    %77 = vector.extract_strided_slice %74 {offsets = [4, 0], sizes = [20, 16], strides = [1, 1]} : vector<24x16xf32> to vector<20x16xf32>
    %78 = tpu.concatenate %75, %76, %77 in 1 : vector<20x16xf32>, vector<20x16xf32>, vector<20x16xf32> -> vector<20x48xf32>
    %79 = arith.truncf %78 : vector<20x48xf32> to vector<20x48xbf16>
    %cst_24 = arith.constant dense<0.000000e+00> : vector<20x16xf32>
    %80 = tpu.matmul %79, %0, %cst_24 {dimension_numbers = #tpu.dot_dimension_numbers<[1], [0], [0], [1], [0, 0, 1, 1], [], []>} : vector<20x48xbf16>, vector<48x16xbf16>, vector<20x16xf32> -> vector<20x16xf32>
    %81 = vector.broadcast %1 : vector<1x16xf32> to vector<20x16xf32>
    %82 = arith.addf %80, %81 : vector<20x16xf32>
    %83 = vector.broadcast %47 : vector<20x1xf32> to vector<20x16xf32>
    %84 = arith.mulf %82, %83 : vector<20x16xf32>
    %85 = arith.addf %84, %56 : vector<20x16xf32>
    %86 = vector.extract_strided_slice %2 {offsets = [0, 2], sizes = [20, 1], strides = [1, 1]} : vector<20x3xf32> to vector<20x1xf32>
    %cst_25 = arith.constant 0.000000e+00 : f32
    %87 = vector.broadcast %cst_25 : f32 to vector<4x16xf32>
    %88 = tpu.concatenate %85, %87 in 0 : vector<20x16xf32>, vector<4x16xf32> -> vector<24x16xf32>
    %89 = vector.extract_strided_slice %88 {offsets = [0, 0], sizes = [20, 16], strides = [1, 1]} : vector<24x16xf32> to vector<20x16xf32>
    %90 = vector.extract_strided_slice %88 {offsets = [2, 0], sizes = [20, 16], strides = [1, 1]} : vector<24x16xf32> to vector<20x16xf32>
    %91 = arith.maximumf %89, %90 : vector<20x16xf32>
    %92 = vector.extract_strided_slice %88 {offsets = [4, 0], sizes = [20, 16], strides = [1, 1]} : vector<24x16xf32> to vector<20x16xf32>
    %93 = arith.maximumf %91, %92 : vector<20x16xf32>
    %94 = vector.broadcast %86 : vector<20x1xf32> to vector<20x16xf32>
    %95 = arith.mulf %93, %94 : vector<20x16xf32>
    %cst_26 = arith.constant 0.000000e+00 : f32
    %96 = vector.broadcast %cst_26 : f32 to vector<20x16xf32>
    %97 = arith.maximumf %95, %96 : vector<20x16xf32>
    %cst_27 = arith.constant 0.000000e+00 : f32
    %98 = vector.broadcast %cst_27 : f32 to vector<4x16xf32>
    %99 = tpu.concatenate %98, %97, %98 in 0 : vector<4x16xf32>, vector<20x16xf32>, vector<4x16xf32> -> vector<28x16xf32>
    %100 = vector.extract_strided_slice %99 {offsets = [0, 0], sizes = [20, 16], strides = [1, 1]} : vector<28x16xf32> to vector<20x16xf32>
    %101 = vector.extract_strided_slice %99 {offsets = [4, 0], sizes = [20, 16], strides = [1, 1]} : vector<28x16xf32> to vector<20x16xf32>
    %102 = vector.extract_strided_slice %99 {offsets = [8, 0], sizes = [20, 16], strides = [1, 1]} : vector<28x16xf32> to vector<20x16xf32>
    %103 = tpu.concatenate %100, %101, %102 in 1 : vector<20x16xf32>, vector<20x16xf32>, vector<20x16xf32> -> vector<20x48xf32>
    %104 = arith.truncf %103 : vector<20x48xf32> to vector<20x48xbf16>
    %cst_28 = arith.constant dense<0.000000e+00> : vector<20x16xf32>
    %105 = tpu.matmul %104, %0, %cst_28 {dimension_numbers = #tpu.dot_dimension_numbers<[1], [0], [0], [1], [0, 0, 1, 1], [], []>} : vector<20x48xbf16>, vector<48x16xbf16>, vector<20x16xf32> -> vector<20x16xf32>
    %106 = vector.broadcast %1 : vector<1x16xf32> to vector<20x16xf32>
    %107 = arith.addf %105, %106 : vector<20x16xf32>
    %108 = vector.broadcast %86 : vector<20x1xf32> to vector<20x16xf32>
    %109 = arith.mulf %107, %108 : vector<20x16xf32>
    %cst_29 = arith.constant 0.000000e+00 : f32
    %110 = vector.broadcast %cst_29 : f32 to vector<20x16xf32>
    %111 = arith.maximumf %109, %110 : vector<20x16xf32>
    %cst_30 = arith.constant 0.000000e+00 : f32
    %112 = vector.broadcast %cst_30 : f32 to vector<4x16xf32>
    %113 = tpu.concatenate %112, %111, %112 in 0 : vector<4x16xf32>, vector<20x16xf32>, vector<4x16xf32> -> vector<28x16xf32>
    %114 = vector.extract_strided_slice %113 {offsets = [0, 0], sizes = [20, 16], strides = [1, 1]} : vector<28x16xf32> to vector<20x16xf32>
    %115 = vector.extract_strided_slice %113 {offsets = [4, 0], sizes = [20, 16], strides = [1, 1]} : vector<28x16xf32> to vector<20x16xf32>
    %116 = vector.extract_strided_slice %113 {offsets = [8, 0], sizes = [20, 16], strides = [1, 1]} : vector<28x16xf32> to vector<20x16xf32>
    %117 = tpu.concatenate %114, %115, %116 in 1 : vector<20x16xf32>, vector<20x16xf32>, vector<20x16xf32> -> vector<20x48xf32>
    %118 = arith.truncf %117 : vector<20x48xf32> to vector<20x48xbf16>
    %cst_31 = arith.constant dense<0.000000e+00> : vector<20x16xf32>
    %119 = tpu.matmul %118, %0, %cst_31 {dimension_numbers = #tpu.dot_dimension_numbers<[1], [0], [0], [1], [0, 0, 1, 1], [], []>} : vector<20x48xbf16>, vector<48x16xbf16>, vector<20x16xf32> -> vector<20x16xf32>
    %120 = vector.broadcast %1 : vector<1x16xf32> to vector<20x16xf32>
    %121 = arith.addf %119, %120 : vector<20x16xf32>
    %122 = vector.broadcast %86 : vector<20x1xf32> to vector<20x16xf32>
    %123 = arith.mulf %121, %122 : vector<20x16xf32>
    %124 = arith.addf %123, %95 : vector<20x16xf32>
    %125 = vector.extract_strided_slice %124 {offsets = [1, 0], sizes = [1, 16], strides = [1, 1]} : vector<20x16xf32> to vector<1x16xf32>
    %126 = vector.extract_strided_slice %124 {offsets = [11, 0], sizes = [1, 16], strides = [1, 1]} : vector<20x16xf32> to vector<1x16xf32>
    %127 = tpu.concatenate %125, %126 in 0 : vector<1x16xf32>, vector<1x16xf32> -> vector<2x16xf32>
    %128 = vector.extract_strided_slice %124 {offsets = [5, 0], sizes = [1, 16], strides = [1, 1]} : vector<20x16xf32> to vector<1x16xf32>
    %129 = vector.extract_strided_slice %124 {offsets = [15, 0], sizes = [1, 16], strides = [1, 1]} : vector<20x16xf32> to vector<1x16xf32>
    %130 = tpu.concatenate %128, %129 in 0 : vector<1x16xf32>, vector<1x16xf32> -> vector<2x16xf32>
    %131 = tpu.concatenate %127, %130 in 1 : vector<2x16xf32>, vector<2x16xf32> -> vector<2x32xf32>
    %132 = arith.truncf %131 : vector<2x32xf32> to vector<2x32xbf16>
    %c0_32 = arith.constant 0 : index
    %c0_33 = arith.constant 0 : index
    %133 = vector.load %arg6[%c0_32, %c0_33] : memref<32x128xbf16, #tpu.memory_space<vmem>>, vector<32x128xbf16>
    %cst_34 = arith.constant dense<0.000000e+00> : vector<2x128xf32>
    %134 = tpu.matmul %132, %133, %cst_34 {dimension_numbers = #tpu.dot_dimension_numbers<[1], [0], [0], [1], [0, 0, 1, 1], [], []>} : vector<2x32xbf16>, vector<32x128xbf16>, vector<2x128xf32> -> vector<2x128xf32>
    %c0_35 = arith.constant 0 : index
    %c0_36 = arith.constant 0 : index
    %135 = vector.load %arg7[%c0_35, %c0_36] : memref<1x128xf32, #tpu.memory_space<vmem>>, vector<1x128xf32>
    %136 = vector.broadcast %135 : vector<1x128xf32> to vector<2x128xf32>
    %137 = arith.addf %134, %136 : vector<2x128xf32>
    %cst_37 = arith.constant dense<0xFF800000> : vector<2xf32>
    %138 = vector.multi_reduction <maximumf>, %137, %cst_37 [1] : vector<2x128xf32> to vector<2xf32>
    %139 = vector.shape_cast %138 : vector<2xf32> to vector<2x1xf32>
    %140 = vector.broadcast %139 : vector<2x1xf32> to vector<2x128xf32>
    %141 = arith.subf %137, %140 : vector<2x128xf32>
    %142 = math.exp %141 : vector<2x128xf32>
    %cst_38 = arith.constant dense<0.000000e+00> : vector<2xf32>
    %143 = vector.multi_reduction <add>, %142, %cst_38 [1] : vector<2x128xf32> to vector<2xf32>
    %144 = vector.shape_cast %143 : vector<2xf32> to vector<2x1xf32>
    %145 = tpu.reciprocal %144 {approx = true} : vector<2x1xf32> -> vector<2x1xf32>
    %146 = vector.broadcast %145 : vector<2x1xf32> to vector<2x128xf32>
    %147 = arith.mulf %142, %146 : vector<2x128xf32>
    %c0_39 = arith.constant 0 : index
    %c0_40 = arith.constant 0 : index
    %148 = vector.load %arg8[%c0_39, %c0_40] : memref<2x128xf32, #tpu.memory_space<vmem>>, vector<2x128xf32>
    tpu.vector_store %arg8[%c0_39, %c0_40], %147 {strides = array<i32>} : memref<2x128xf32, #tpu.memory_space<vmem>>, vector<2x128xf32>,
    return
  }
}

</mosaic_0001>

<bundles_post_ra>
// kernel: dpcnn_forward.1
= control target key start
LH: loop header
LB: loop body
LE: loop exit
PB: predicated region body
PF: predicated region fallthrough
CT: control target
= control target key end

     0   :  { %vm47_vm0 = vcmask 1040384   ;;  %vm57_vm1 = vcmask 1044480   ;;  %vm61_vm2 = vcmask 1046528   ;;  %vm76_vm3 = vcmask 1045504   ;;  %s1584_s18 = smov 100   ;;  %s1585_s25 = smov 72   ;;  %s2039_s0 = inlined_call_operand.vmem [shape: f32[20,100], index: 0, kind: input, shape index: {}]   ;;  %s2040_s1 = inlined_call_operand.vmem [shape: f32[20,3], index: 1, kind: input, shape index: {}]   ;;  %s2041_s2 = inlined_call_operand.vmem [shape: bf16[300,16], index: 2, kind: input, shape index: {}]   ;;  %s2042_s3 = inlined_call_operand.vmem [shape: f32[1,16], index: 3, kind: input, shape index: {}]   ;;  %s2043_s4 = inlined_call_operand.vmem [shape: bf16[48,16], index: 4, kind: input, shape index: {}]   ;;  %s2044_s5 = inlined_call_operand.vmem [shape: f32[1,16], index: 5, kind: input, shape index: {}]   ;;  %s2045_s6 = inlined_call_operand.vmem [shape: bf16[32,128], index: 6, kind: input, shape index: {}]   ;;  %s2046_s7 = inlined_call_operand.vmem [shape: f32[1,128], index: 7, kind: input, shape index: {}]   ;;  %s2047_s8 = inlined_call_operand.hbm [shape: f32[2,128], index: 8, kind: output, shape index: {}]  }
   0x1   :  { %v41_v0 = vld [vmem:[%s2039_s0] sm:$0xff]  ;;  %v42_v1 = vld [vmem:[%s2039_s0 + $0x8] sm:$0xff]  ;;  %v43_v2 = vld [vmem:[%s2039_s0 + $0x10] sm:$0xf]  ;;  %v1586_v34 = vmov 0  }
   0x2   :  { %v48_v3 = vrot.slane %v41_v0, 7  ;;  %v49_v4 = vrot.slane %v42_v1, 7  ;;  %v51_v5 = vrot.slane %v43_v2, 7  ;;  %v1534_v6 = vld [vmem:[%s2041_s2 + $0x78] sm:$0xff]   ;;  %v1536_v18 = vld [vmem:[%s2041_s2 + $0x70] sm:$0xff]   ;;  %v1538_v24 = vld [vmem:[%s2041_s2 + $0x68] sm:$0xff]   ;;  %1469 = vset.pattern.permute.xlu1 %v1586_v34  ;;  %1468 = vset.pattern.permute.xlu0 %v1586_v34 }
   0x3   :  { %v1535_v10 = vld [vmem:[%s2041_s2 + $0x38] sm:$0xff]   ;;  %1303 = vmatprep.subr.bf16.mxu0 %v1534_v6  ;;  %v1537_v20 = vld [vmem:[%s2041_s2 + $0x30] sm:$0xff]   ;;  %v1539_v26 = vld [vmem:[%s2041_s2 + $0x28] sm:$0xff]  }
   0x4   :  { %v1652_v7 = vsel %vm47_vm0, %v48_v3, %v49_v4  ;;  %v52_v8 = vsel %vm47_vm0, %v49_v4, %v51_v5  ;;  %v1656_v9 = vsel %vm47_vm0, 0.0, %v48_v3  ;;  %1304 = vmatpush3.bf16.msra.mxu0 %v1535_v10  ;;  %v1540_v28 = vld [vmem:[%s2041_s2 + $0x60] sm:$0xff]   ;;  %v1542_v30 = vld [vmem:[%s2041_s2 + $0x58] sm:$0xff]   ;;  %v1545_v31 = vld [vmem:[%s2041_s2 + $0x90] sm:$0x3f]  }
   0x5   :  { %v1662_v11 = vsel %vm57_vm1, %v52_v8, 0.0  ;;  %v62_v12 = vrot.slane %v1656_v9, 1  ;;  %v63_v13 = vrot.slane %v1652_v7, 1  ;;  %v77_v14 = vrot.slane %v1656_v9, 2  ;;  %1305 = vmatprep.subr.bf16.mxu0 %v1536_v18  ;;  %v1541_v29 = vld [vmem:[%s2041_s2 + $0x20] sm:$0xff]   ;;  %v1543_v32 = vld [vmem:[%s2041_s2 + $0x18] sm:$0xff]   ;;  %1447 = vmatprep.subr.msk.bf16.mxu1 %vm76_vm3, %v1545_v31 }
   0x6   :  { %v65_v15 = vrot.slane %v1662_v11, 1  ;;  %v78_v16 = vrot.slane %v1652_v7, 2  ;;  %v80_v17 = vrot.slane %v1662_v11, 2  ;;  %v271_v33 = vsel %vm76_vm3, %v1545_v31, 0  ;;  %v1548_v35 = vld [vmem:[%s2041_s2 + $0x88] sm:$0xff]   ;;  %v1544_v36 = vld [vmem:[%s2041_s2 + $0x50] sm:$0xff]  }
   0x7   :  { %v64_v19 = vsel %vm61_vm2, %v62_v12, %v63_v13  ;;  %1370 = vmatpush3.bf16.msra.mxu1 %v271_v33  ;;  %v1546_v37 = vld [vmem:[%s2041_s2 + $0x10] sm:$0xff]   ;;  %v1551_v38 = vld [vmem:[%s2041_s2 + $0x80] sm:$0xff]   ;;  %v1547_v39 = vld [vmem:[%s2041_s2 + $0x48] sm:$0xff]  }
   0x8   :  { %v66_v21 = vsel %vm61_vm2, %v63_v13, %v65_v15  ;;  %71 = vrot.lane.b32.xlu1 %v65_v15, %s1584_s18  ;;  %v79_v22 = vsel %vm76_vm3, %v77_v14, %v78_v16  ;;  %v81_v23 = vsel %vm76_vm3, %v78_v16, %v80_v17  ;;  %1306 = vmatpush3.bf16.msra.mxu0 %v1537_v20  ;;  %v1721_v40 = vld [vmem:[%s2040_s1 + $0x10] sm:$0xf]  ;;  %v1726_v41 = vld [vmem:[%s2040_s1] sm:$0xff]  ;;  %v1731_v42 = vld [vmem:[%s2040_s1 + $0x8] sm:$0xff] }
   0x9   :  { %v1458_v25 = vpack.i.bf16 %v66_v21, %v64_v19  ;;  %v1463_v27 = vpack.i.bf16 %v81_v23, %v79_v22  ;;  %1307 = vmatprep.subr.bf16.mxu0 %v1538_v24  ;;  %1371 = vmatprep.subr.bf16.mxu1 %v1548_v35  ;;  %v1549_v43 = vld [vmem:[%s2041_s2 + $0x8] sm:$0xff]   ;;  %v1550_v44 = vld [vmem:[%s2041_s2 + $0x40] sm:$0xff]  }
   0xb   :  { %1459 = vrot.lane.b32.xlu0 %v1458_v25, %s1584_s18  ;;  %1372 = vmatpush3.bf16.msra.mxu1 %v1548_v35 }
   0xc   :  { %86 = vrot.lane.b32.xlu1 %v80_v17, %s1585_s25  ;;  %1308 = vmatpush3.bf16.msra.mxu0 %v1539_v26 }
   0xd   :  { %1309 = vmatprep.subr.bf16.mxu0 %v1540_v28  ;;  %1373 = vmatprep.subr.bf16.mxu1 %v1551_v38 }
   0xf   :  { %1464 = vrot.lane.b32.xlu0 %v1463_v27, %s1585_s25  ;;  %1374 = vmatpush3.bf16.msra.mxu1 %v1551_v38 }
  0x10   :  { %1310 = vmatpush3.bf16.msra.mxu0 %v1541_v29  ;;  %381 = vperm.xlu1 %1469, %v1721_v40  }
  0x11   :  { %1311 = vmatprep.subr.bf16.mxu0 %v1542_v30 }
  0x13   :  { %376 = vperm.xlu0 %1468, %v1731_v42  }
  0x14   :  { %1312 = vmatpush3.bf16.msra.mxu0 %v1543_v32 }
  0x15   :  { %1313 = vmatprep.subr.bf16.mxu0 %v1544_v36 }
  0x18   :  { %1314 = vmatpush3.bf16.msra.mxu0 %v1546_v37 }
  0x19   :  { %1315 = vmatprep.subr.bf16.mxu0 %v1547_v39 }
  0x1a   :  { %13 = vsyncpa [#allocation3], 0  ;;  %371 = vperm.xlu1 %1469, %v1726_v41   ;;  %v1552_v45 = vld [vmem:[%s2041_s2] sm:$0xff]   ;;  %vm91_vm4 = vcmask 818176   ;;  %vm95_vm5 = vcmask 588800   ;;  %vm263_vm6 = vcmask 359424  }
  0x1b   :  { %v1765_v27 = vld [vmem:[%s2043_s4 + $0x10] sm:$0xff]   ;;  %v1775_v34 = vld [vmem:[%s2043_s4 + $0x8] sm:$0xff]   ;;  %v1785_v39 = vld [vmem:[%s2043_s4] sm:$0xff]   ;;  %s1587_s4 = smov 16   ;;  %s1588_s15 = smov 32   ;;  %vm433_vm7 = vcmask 130048  }
  0x1c   :  { %1316 = vmatpush3.bf16.msra.mxu0 %v1549_v43  ;;  %1379 = vmatprep.subr.bf16.mxu1 %v1765_v27  ;;  %vm437_vm8 = vcmask 261120   ;;  %vm467_vm9 = vcmask 392192   ;;  %vm636_vm10 = vcmask 1043456   ;;  %vm684_vm11 = vcmask 1041408   ;;  %s1593_s22 = smov [#allocation2]  }
  0x1d   :  { %1317 = vmatprep.subr.bf16.mxu0 %v1550_v44  ;;  %vm1592_vm12 = vmmov 0  }
  0x20   :  { %1318 = vmatpush3.bf16.msra.mxu0 %v1552_v45 }
  0x21   :  { %1399 = vmatprep.subr.bf16.mxu0 %v1765_v27 }
  0x7a   :  { %v72_v46 = vpop.permute.xlu1 %71 }
  0x7b   :  { %v94_v0 = vsel %vm91_vm4, %v1662_v11, %v72_v46 }
  0x7c   :  { %v102_v1 = vpack.c.bf16 %v94_v0, %v94_v0 }
  0x7d   :  { %v1460_v47 = vpop.permute.xlu0 %1459 }
  0x7e   :  { %v1462_v48 = vunpack.i.h.bf16 %v1460_v47  ;;  %v1461_v49 = vunpack.i.l.bf16 %v1460_v47  ;;  %v87_v50 = vpop.permute.xlu1 %86 }
  0x7f   :  { %v98_v54 = vsel %vm95_vm5, %v72_v46, %v87_v50  ;;  %v104_v55 = vpack.c.bf16 %v87_v50, %v87_v50 }
  0x80   :  { %v92_v56 = vsel %vm91_vm4, %v1656_v9, %v1461_v49  ;;  %v93_v57 = vsel %vm91_vm4, %v1652_v7, %v1462_v48  ;;  %v103_v61 = vpack.c.bf16 %v98_v54, %v98_v54  ;;  %v1261_v7 = vld [vmem:[%s2042_s3] ss:$0 sm:$0xff] }
  0x81   :  { %v1465_v51 = vpop.permute.xlu0 %1464  ;;  %v99_v63 = vpack.c.bf16 %v93_v57, %v92_v56 }
  0x82   :  { %v1467_v52 = vunpack.i.h.bf16 %v1465_v51  ;;  %v1466_v53 = vunpack.i.l.bf16 %v1465_v51 }
  0x84   :  { %v101_v58 = vpack.c.bf16 %v1467_v52, %v1466_v53  ;;  %v96_v59 = vsel %vm95_vm5, %v1461_v49, %v1466_v53  ;;  %v97_v60 = vsel %vm95_vm5, %v1462_v48, %v1467_v52 }
  0x85   :  { %v100_v62 = vpack.c.bf16 %v97_v60, %v96_v59 }
  0x86   :  { %1375 = vmatprep.mubr.msk.bf16.mxu1 %vm263_vm6, %v101_v58 }
  0x87   :  { %305 = vmatprep.mubr.bf16.mxu0 %v100_v62  ;;  %1376 = vmatmul.mubr.msk.bf16.vlgmr.msra.gmra.mxu1 %vm263_vm6, %v104_v55 }
  0x88   :  { %306 = vmatmul.mubr.bf16.vlgmr.msra.gmra.mxu0 %v99_v63  ;;  %1380 = vmatpush3.bf16.msra.mxu1 %v1765_v27 }
  0x89   :  { %313 = vmatprep.mubr.bf16.mxu0 %v103_v61  ;;  %1400 = vmatpush3.bf16.msra.mxu0 %v1765_v27 }
  0x8a   :  { %1381 = vmatprep.subr.bf16.mxu1 %v1775_v34  ;;  %1401 = vmatprep.subr.bf16.mxu0 %v1775_v34 }
  0x8b   :  { %v1751_v5 = vpop.permute.xlu1 %381 }
  0x8c   :  { %1382 = vmatpush3.bf16.msra.mxu1 %v1775_v34 }
  0x8d   :  { %1402 = vmatpush3.bf16.msra.mxu0 %v1775_v34  ;;  %1383 = vmatprep.subr.bf16.mxu1 %v1785_v39 }
  0x8e   :  { %v1758_v18 = vpop.permute.xlu0 %376  ;;  %1403 = vmatprep.subr.bf16.mxu0 %v1785_v39 }
  0x90   :  { %314 = vmatmul.mubr.bf16.gmra.mxu0 %v102_v1  ;;  %1384 = vmatpush3.bf16.msra.mxu1 %v1785_v39 }
  0x91   :  { %1404 = vmatpush3.bf16.msra.mxu0 %v1785_v39  ;;  %1389 = vmatprep.subr.bf16.mxu1 %v1765_v27 }
  0x92   :  { %1419 = vmatprep.subr.bf16.mxu0 %v1765_v27 }
  0x95   :  { %v1756_v11 = vpop.permute.xlu1 %371 }
 0x147   :  { %v1377_v2 = vpop.f32.mrf.mxu1 }
 0x148   :  { %v1319_v3 = vpop.f32.mrf.mxu0 }
 0x149   :  { %v355_v4 = vpop.f32.mrf.mxu1 }
 0x14a   :  { %v1320_v6 = vpop.f32.mrf.mxu0 }
 0x14b   :  { %v1321_v8 = vadd.f32 %v1320_v6, %v1319_v3  ;;  %v1378_v9 = vpop.f32.mrf.mxu1 }
 0x14c   :  { %v1322_v10 = vpop.f32.mrf.mxu0 }
 0x14d   :  { %v308_v12 = vadd.f32 %v1321_v8, %v1261_v7  ;;  %v358_v19 = vpop.f32.mrf.mxu1 }
 0x14e   :  { %v1323_v13 = vpop.f32.mrf.mxu0 }
 0x14f   :  { %v356_v14 = vadd.f32 %v355_v4, %v308_v12  ;;  %v1324_v15 = vadd.f32 %v1323_v13, %v1322_v10  ;;  %v1821_v12 = vld [vmem:[%s2044_s5] ss:$0 sm:$0xff] }
 0x150   :  { %v1325_v16 = vpop.f32.mrf.mxu0 }
 0x151   :  { %v311_v17 = vadd.f32 %v1324_v15, %v1261_v7  ;;  %v384_v20 = vmul.f32 %v1756_v11, %v356_v14 }
 0x152   :  { %v1326_v21 = vpop.f32.mrf.mxu0 }
 0x153   :  { %v359_v22 = vadd.f32 %v358_v19, %v311_v17  ;;  %v1327_v23 = vadd.f32 %v1326_v21, %v1325_v16  ;;  %v387_v28 = vmax.f32 %v384_v20, 0.0 }
 0x154   :  { %v1328_v24 = vpop.f32.mrf.mxu0 }
 0x155   :  { %v316_v25 = vadd.f32 %v1327_v23, %v1261_v7  ;;  %v385_v26 = vmul.f32 %v1758_v18, %v359_v22  ;;  %v393_v35 = vrot.slane %v387_v28, 7 }
 0x156   :  { %v1329_v29 = vpop.f32.mrf.mxu0 }
 0x157   :  { %v364_v30 = vadd.f32 %v1377_v2, %v316_v25  ;;  %v388_v31 = vmax.f32 %v385_v26, 0.0  ;;  %v401_v43 = vsel %vm47_vm0, 0.0, %v393_v35 }
 0x158   :  { %v405_v47 = vrot.slane %v401_v43, 1  ;;  %v419_v54 = vrot.slane %v401_v43, 2 }
 0x159   :  { %v386_v32 = vmul.f32 %v1751_v5, %v364_v30  ;;  %v394_v33 = vrot.slane %v388_v31, 7 }
 0x15b   :  { %v389_v36 = vmax.f32 %v386_v32, 0.0  ;;  %v395_v37 = vsel %vm47_vm0, %v393_v35, %v394_v33 }
 0x15c   :  { %v406_v45 = vrot.slane %v395_v37, 1  ;;  %v420_v52 = vrot.slane %v395_v37, 2 }
 0x15d   :  { %v396_v38 = vrot.slane %v389_v36, 7 }
 0x15e   :  { %v407_v50 = vsel %vm61_vm2, %v405_v47, %v406_v45  ;;  %v421_v56 = vsel %vm76_vm3, %v419_v54, %v420_v52 }
 0x15f   :  { %v397_v44 = vsel %vm47_vm0, %v394_v33, %v396_v38 }
 0x160   :  { %v402_v46 = vsel %vm57_vm1, %v397_v44, 0.0 }
 0x161   :  { %v408_v48 = vrot.slane %v402_v46, 1  ;;  %v422_v49 = vrot.slane %v402_v46, 2 }
 0x163   :  { %414 = vrot.lane.b32.xlu1 %v408_v48, %s1587_s4  ;;  %v409_v51 = vsel %vm61_vm2, %v406_v45, %v408_v48  ;;  %v423_v55 = vsel %vm76_vm3, %v420_v52, %v422_v49 }
 0x164   :  { %v1470_v53 = vpack.i.bf16 %v409_v51, %v407_v50  ;;  %v1475_v57 = vpack.i.bf16 %v423_v55, %v421_v56 }
 0x166   :  { %1471 = vrot.lane.b32.xlu0 %v1470_v53, %s1587_s4 }
 0x167   :  { %428 = vrot.lane.b32.xlu1 %v422_v49, %s1588_s15  ;;  %v1589_v49 = vmov 1  }
 0x168   :  { %1491 = vset.pattern.permute.xlu1 %v1589_v49  ;;  %1490 = vset.pattern.permute.xlu0 %v1589_v49 }
 0x16a   :  { %1476 = vrot.lane.b32.xlu0 %v1475_v57, %s1588_s15 }
 0x1d5   :  { %v415_v58 = vpop.permute.xlu1 %414 }
 0x1d6   :  { %v436_v0 = vsel %vm433_vm7, %v402_v46, %v415_v58 }
 0x1d8   :  { %v1472_v59 = vpop.permute.xlu0 %1471 }
 0x1d9   :  { %v1474_v60 = vunpack.i.h.bf16 %v1472_v59  ;;  %v1473_v61 = vunpack.i.l.bf16 %v1472_v59  ;;  %v429_v62 = vpop.permute.xlu1 %428 }
 0x1da   :  { %v440_v6 = vsel %vm437_vm8, %v436_v0, %v429_v62 }
 0x1db   :  { %v435_v3 = vsel %vm433_vm7, %v395_v37, %v1474_v60  ;;  %v434_v4 = vsel %vm433_vm7, %v401_v43, %v1473_v61  ;;  %v442_v10 = vpack.c.bf16 %v440_v6, %v440_v6 }
 0x1dc   :  { %v1477_v63 = vpop.permute.xlu0 %1476 }
 0x1dd   :  { %v1479_v1 = vunpack.i.h.bf16 %v1477_v63  ;;  %v1478_v2 = vunpack.i.l.bf16 %v1477_v63 }
 0x1df   :  { %v438_v7 = vsel %vm437_vm8, %v434_v4, %v1478_v2  ;;  %v439_v8 = vsel %vm437_vm8, %v435_v3, %v1479_v1 }
 0x1e0   :  { %v441_v9 = vpack.c.bf16 %v439_v8, %v438_v7 }
 0x1e2   :  { %1385 = vmatprep.mubr.msk.bf16.mxu1 %vm467_vm9, %v441_v9 }
 0x1e3   :  { %1386 = vmatmul.mubr.msk.bf16.vlgmr.msra.gmra.mxu1 %vm467_vm9, %v442_v10 }
 0x1e4   :  { %1390 = vmatpush3.bf16.msra.mxu1 %v1765_v27 }
 0x1e5   :  { %1391 = vmatprep.subr.bf16.mxu1 %v1775_v34 }
 0x1e8   :  { %1392 = vmatpush3.bf16.msra.mxu1 %v1775_v34 }
 0x1e9   :  { %1393 = vmatprep.subr.bf16.mxu1 %v1785_v39 }
 0x1ec   :  { %1394 = vmatpush3.bf16.msra.mxu1 %v1785_v39 }
 0x1ed   :  { %1409 = vmatprep.subr.bf16.mxu1 %v1765_v27 }
 0x2a3   :  { %v1387_v13 = vpop.f32.mrf.mxu1 }
 0x2a4   :  { %v517_v14 = vadd.f32 %v1387_v13, %v1821_v12 }
 0x2a5   :  { %v508_v15 = vpop.f32.mrf.mxu1 }
 0x2a6   :  { %v509_v16 = vadd.f32 %v1821_v12, %v508_v15  ;;  %v524_v19 = vmul.f32 %v517_v14, %v1751_v5 }
 0x2a7   :  { %v1388_v17 = vpop.f32.mrf.mxu1 }
 0x2a8   :  { %v522_v20 = vmul.f32 %v509_v16, %v1756_v11  ;;  %v527_v24 = vmax.f32 %v524_v19, 0.0 }
 0x2a9   :  { %v511_v21 = vpop.f32.mrf.mxu1 }
 0x2aa   :  { %v525_v22 = vmax.f32 %v522_v20, 0.0  ;;  %v512_v23 = vadd.f32 %v1821_v12, %v511_v21  ;;  %v534_v29 = vrot.slane %v527_v24, 7 }
 0x2ac   :  { %v531_v25 = vrot.slane %v525_v22, 7  ;;  %v523_v26 = vmul.f32 %v512_v23, %v1758_v18 }
 0x2ae   :  { %v526_v28 = vmax.f32 %v523_v26, 0.0  ;;  %v539_v30 = vsel %vm47_vm0, 0.0, %v531_v25 }
 0x2af   :  { %v543_v35 = vrot.slane %v539_v30, 1  ;;  %v557_v46 = vrot.slane %v539_v30, 2 }
 0x2b0   :  { %v532_v31 = vrot.slane %v526_v28, 7 }
 0x2b2   :  { %v533_v32 = vsel %vm47_vm0, %v531_v25, %v532_v31  ;;  %v535_v33 = vsel %vm47_vm0, %v532_v31, %v534_v29 }
 0x2b3   :  { %v540_v36 = vsel %vm57_vm1, %v535_v33, 0.0  ;;  %v544_v37 = vrot.slane %v533_v32, 1  ;;  %v558_v44 = vrot.slane %v533_v32, 2 }
 0x2b4   :  { %v546_v38 = vrot.slane %v540_v36, 1  ;;  %v560_v43 = vrot.slane %v540_v36, 2 }
 0x2b5   :  { %v545_v45 = vsel %vm61_vm2, %v543_v35, %v544_v37  ;;  %v559_v50 = vsel %vm76_vm3, %v557_v46, %v558_v44 }
 0x2b6   :  { %552 = vrot.lane.b32.xlu1 %v546_v38, %s1587_s4  ;;  %v547_v47 = vsel %vm61_vm2, %v544_v37, %v546_v38  ;;  %v561_v51 = vsel %vm76_vm3, %v558_v44, %v560_v43 }
 0x2b7   :  { %v1480_v48 = vpack.i.bf16 %v547_v47, %v545_v45  ;;  %v1485_v52 = vpack.i.bf16 %v561_v51, %v559_v50 }
 0x2b9   :  { %1481 = vrot.lane.b32.xlu0 %v1480_v48, %s1587_s4 }
 0x2ba   :  { %566 = vrot.lane.b32.xlu1 %v560_v43, %s1588_s15 }
 0x2bd   :  { %1486 = vrot.lane.b32.xlu0 %v1485_v52, %s1588_s15 }
 0x2be   :  { %672 = vperm.xlu1 %1491, %v1721_v40  }
 0x2c1   :  { %668 = vperm.xlu0 %1490, %v1731_v42  }
 0x2c2   :  { %664 = vperm.xlu1 %1491, %v1726_v41  }
 0x328   :  { %v553_v53 = vpop.permute.xlu1 %552 }
 0x329   :  { %v573_v59 = vsel %vm433_vm7, %v540_v36, %v553_v53 }
 0x32b   :  { %v1482_v54 = vpop.permute.xlu0 %1481 }
 0x32c   :  { %v1484_v55 = vunpack.i.h.bf16 %v1482_v54  ;;  %v1483_v56 = vunpack.i.l.bf16 %v1482_v54  ;;  %v567_v57 = vpop.permute.xlu1 %566 }
 0x32d   :  { %v576_v0 = vsel %vm437_vm8, %v573_v59, %v567_v57 }
 0x32e   :  { %v572_v62 = vsel %vm433_vm7, %v533_v32, %v1484_v55  ;;  %v571_v63 = vsel %vm433_vm7, %v539_v30, %v1483_v56  ;;  %v578_v4 = vpack.c.bf16 %v576_v0, %v576_v0 }
 0x32f   :  { %v1487_v58 = vpop.permute.xlu0 %1486 }
 0x330   :  { %v1489_v60 = vunpack.i.h.bf16 %v1487_v58  ;;  %v1488_v61 = vunpack.i.l.bf16 %v1487_v58 }
 0x332   :  { %v574_v1 = vsel %vm437_vm8, %v571_v63, %v1488_v61  ;;  %v575_v2 = vsel %vm437_vm8, %v572_v62, %v1489_v60 }
 0x333   :  { %v577_v3 = vpack.c.bf16 %v575_v2, %v574_v1 }
 0x335   :  { %1395 = vmatprep.mubr.msk.bf16.mxu1 %vm467_vm9, %v577_v3 }
 0x336   :  { %1396 = vmatmul.mubr.msk.bf16.vlgmr.msra.gmra.mxu1 %vm467_vm9, %v578_v4 }
 0x337   :  { %1410 = vmatpush3.bf16.msra.mxu1 %v1765_v27 }
 0x338   :  { %1411 = vmatprep.subr.bf16.mxu1 %v1775_v34 }
 0x33b   :  { %1412 = vmatpush3.bf16.msra.mxu1 %v1775_v34 }
 0x33c   :  { %1413 = vmatprep.subr.bf16.mxu1 %v1785_v39  ;;  %v1873_v35 = vpop.permute.xlu0 %668 }
 0x33f   :  { %1414 = vmatpush3.bf16.msra.mxu1 %v1785_v39 }
 0x340   :  { %1429 = vmatprep.subr.bf16.mxu1 %v1765_v27 }
 0x3f6   :  { %v1397_v6 = vpop.f32.mrf.mxu1 }
 0x3f7   :  { %v628_v7 = vadd.f32 %v1397_v6, %v1821_v12 }
 0x3f8   :  { %v619_v8 = vpop.f32.mrf.mxu1 }
 0x3f9   :  { %v635_v9 = vmul.f32 %v628_v7, %v1751_v5  ;;  %v620_v10 = vadd.f32 %v1821_v12, %v619_v8  ;;  %v1865_v5 = vpop.permute.xlu1 %672 }
 0x3fa   :  { %v1398_v13 = vpop.f32.mrf.mxu1 }
 0x3fb   :  { %v637_v14 = vsel %vm636_vm10, %v635_v9, 0.0  ;;  %v633_v17 = vmul.f32 %v620_v10, %v1756_v11 }
 0x3fc   :  { %v644_v15 = vrot.slane %v637_v14, 1  ;;  %v622_v16 = vpop.f32.mrf.mxu1  ;;  %v655_v21 = vrot.slane %v637_v14, 2 }
 0x3fd   :  { %v623_v19 = vadd.f32 %v1821_v12, %v622_v16  ;;  %v641_v24 = vrot.slane %v633_v17, 1  ;;  %v652_v28 = vrot.slane %v633_v17, 2  ;;  %v1876_v38 = vpop.permute.xlu1 %664 }
 0x3fe   :  { %v651_v20 = vmax.f32 %v637_v14, %v644_v15 }
 0x3ff   :  { %v634_v22 = vmul.f32 %v623_v19, %v1758_v18 }
 0x400   :  { %v662_v23 = vmax.f32 %v651_v20, %v655_v21 }
 0x401   :  { %v642_v25 = vrot.slane %v634_v22, 1  ;;  %v653_v26 = vrot.slane %v634_v22, 2 }
 0x402   :  { %v1870_v11 = vmul.f32 %v1865_v5, %v662_v23 }
 0x403   :  { %v645_v29 = vsel %vm61_vm2, %v642_v25, %v644_v15  ;;  %v643_v30 = vsel %vm61_vm2, %v641_v24, %v642_v25  ;;  %v654_v33 = vsel %vm76_vm3, %v652_v28, %v653_v26  ;;  %v656_v18 = vsel %vm76_vm3, %v653_v26, %v655_v21 }
 0x404   :  { %v650_v31 = vmax.f32 %v634_v22, %v645_v29  ;;  %v649_v32 = vmax.f32 %v633_v17, %v643_v30  ;;  %v680_v43 = vmax.f32 %v1870_v11, 0.0 }
 0x406   :  { %v660_v36 = vmax.f32 %v649_v32, %v654_v33  ;;  %v661_v37 = vmax.f32 %v650_v31, %v656_v18  ;;  %v688_v48 = vrot.slane %v680_v43, 6 }
 0x408   :  { %v1880_v44 = vmul.f32 %v1876_v38, %v660_v36  ;;  %v1883_v45 = vmul.f32 %v1873_v35, %v661_v37 }
 0x40a   :  { %v678_v46 = vmax.f32 %v1880_v44, 0.0  ;;  %v679_v47 = vmax.f32 %v1883_v45, 0.0 }
 0x40c   :  { %v685_v49 = vrot.slane %v678_v46, 6  ;;  %v686_v50 = vrot.slane %v679_v47, 6 }
 0x40e   :  { %v693_v51 = vsel %vm684_vm11, 0.0, %v685_v49  ;;  %v687_v52 = vsel %vm684_vm11, %v685_v49, %v686_v50  ;;  %v689_v53 = vsel %vm684_vm11, %v686_v50, %v688_v48 }
 0x40f   :  { %v694_v54 = vsel %vm76_vm3, %v689_v53, 0.0  ;;  %v697_v55 = vrot.slane %v693_v51, 2  ;;  %v698_v56 = vrot.slane %v687_v52, 2  ;;  %v711_v59 = vrot.slane %v693_v51, 4 }
 0x410   :  { %v700_v57 = vrot.slane %v694_v54, 2  ;;  %v714_v58 = vrot.slane %v694_v54, 4  ;;  %v712_v60 = vrot.slane %v687_v52, 4 }
 0x411   :  { %v699_v61 = vsel %vm76_vm3, %v697_v55, %v698_v56 }
 0x412   :  { %706 = vrot.lane.b32.xlu1 %v700_v57, %s1587_s4  ;;  %v701_v62 = vsel %vm76_vm3, %v698_v56, %v700_v57  ;;  %v713_v0 = vsel %vm636_vm10, %v711_v59, %v712_v60  ;;  %v715_v1 = vsel %vm636_vm10, %v712_v60, %v714_v58 }
 0x413   :  { %v1492_v63 = vpack.i.bf16 %v701_v62, %v699_v61  ;;  %v1497_v2 = vpack.i.bf16 %v715_v1, %v713_v0  ;;  %v1590_v61 = vmov 2  }
 0x414   :  { %1513 = vset.pattern.permute.xlu1 %v1590_v61  ;;  %1512 = vset.pattern.permute.xlu0 %v1590_v61 }
 0x415   :  { %1493 = vrot.lane.b32.xlu0 %v1492_v63, %s1587_s4 }
 0x416   :  { %720 = vrot.lane.b32.xlu1 %v714_v58, %s1588_s15 }
 0x419   :  { %1498 = vrot.lane.b32.xlu0 %v1497_v2, %s1588_s15 }
 0x484   :  { %v707_v3 = vpop.permute.xlu1 %706 }
 0x485   :  { %v727_v10 = vsel %vm433_vm7, %v694_v54, %v707_v3 }
 0x487   :  { %v1494_v4 = vpop.permute.xlu0 %1493 }
 0x488   :  { %v1496_v6 = vunpack.i.h.bf16 %v1494_v4  ;;  %v1495_v7 = vunpack.i.l.bf16 %v1494_v4  ;;  %v721_v8 = vpop.permute.xlu1 %720 }
 0x489   :  { %v730_v17 = vsel %vm437_vm8, %v727_v10, %v721_v8 }
 0x48a   :  { %v726_v15 = vsel %vm433_vm7, %v687_v52, %v1496_v6  ;;  %v725_v16 = vsel %vm433_vm7, %v693_v51, %v1495_v7  ;;  %v732_v22 = vpack.c.bf16 %v730_v17, %v730_v17  ;;  %v1591_v17 = vmov 0.0  }
 0x48b   :  { %v1499_v9 = vpop.permute.xlu0 %1498 }
 0x48c   :  { %v1501_v13 = vunpack.i.h.bf16 %v1499_v9  ;;  %v1500_v14 = vunpack.i.l.bf16 %v1499_v9 }
 0x48e   :  { %v728_v19 = vsel %vm437_vm8, %v725_v16, %v1500_v14  ;;  %v729_v20 = vsel %vm437_vm8, %v726_v15, %v1501_v13 }
 0x48f   :  { %v731_v21 = vpack.c.bf16 %v729_v20, %v728_v19 }
 0x491   :  { %1405 = vmatprep.mubr.msk.bf16.mxu0 %vm467_vm9, %v731_v21 }
 0x492   :  { %1406 = vmatmul.mubr.msk.bf16.vlgmr.msra.gmra.mxu0 %vm467_vm9, %v732_v22 }
 0x493   :  { %1420 = vmatpush3.bf16.msra.mxu0 %v1765_v27 }
 0x494   :  { %1421 = vmatprep.subr.bf16.mxu0 %v1775_v34 }
 0x497   :  { %1422 = vmatpush3.bf16.msra.mxu0 %v1775_v34 }
 0x498   :  { %1423 = vmatprep.subr.bf16.mxu0 %v1785_v39 }
 0x49b   :  { %1424 = vmatpush3.bf16.msra.mxu0 %v1785_v39 }
 0x49c   :  { %1439 = vmatprep.subr.bf16.mxu0 %v1591_v17 }
 0x552   :  { %v1407_v23 = vpop.f32.mrf.mxu0 }
 0x553   :  { %v782_v24 = vadd.f32 %v1407_v23, %v1821_v12 }
 0x554   :  { %v773_v25 = vpop.f32.mrf.mxu0 }
 0x555   :  { %v774_v26 = vadd.f32 %v1821_v12, %v773_v25  ;;  %v789_v29 = vmul.f32 %v782_v24, %v1865_v5 }
 0x556   :  { %v1408_v28 = vpop.f32.mrf.mxu0 }
 0x557   :  { %v787_v30 = vmul.f32 %v774_v26, %v1876_v38  ;;  %v792_v18 = vmax.f32 %v789_v29, 0.0 }
 0x558   :  { %v776_v31 = vpop.f32.mrf.mxu0 }
 0x559   :  { %v790_v32 = vmax.f32 %v787_v30, 0.0  ;;  %v777_v33 = vadd.f32 %v1821_v12, %v776_v31  ;;  %v799_v46 = vrot.slane %v792_v18, 6 }
 0x55b   :  { %v796_v36 = vrot.slane %v790_v32, 6  ;;  %v788_v37 = vmul.f32 %v777_v33, %v1873_v35 }
 0x55d   :  { %v791_v43 = vmax.f32 %v788_v37, 0.0  ;;  %v804_v47 = vsel %vm684_vm11, 0.0, %v796_v36 }
 0x55e   :  { %v808_v51 = vrot.slane %v804_v47, 2  ;;  %v822_v58 = vrot.slane %v804_v47, 4 }
 0x55f   :  { %v797_v48 = vrot.slane %v791_v43, 6 }
 0x561   :  { %v798_v49 = vsel %vm684_vm11, %v796_v36, %v797_v48  ;;  %v800_v50 = vsel %vm684_vm11, %v797_v48, %v799_v46 }
 0x562   :  { %v805_v52 = vsel %vm76_vm3, %v800_v50, 0.0  ;;  %v809_v53 = vrot.slane %v798_v49, 2  ;;  %v823_v56 = vrot.slane %v798_v49, 4 }
 0x563   :  { %v811_v54 = vrot.slane %v805_v52, 2  ;;  %v825_v55 = vrot.slane %v805_v52, 4 }
 0x564   :  { %v810_v57 = vsel %vm76_vm3, %v808_v51, %v809_v53  ;;  %v824_v62 = vsel %vm636_vm10, %v822_v58, %v823_v56 }
 0x565   :  { %817 = vrot.lane.b32.xlu1 %v811_v54, %s1587_s4  ;;  %v812_v59 = vsel %vm76_vm3, %v809_v53, %v811_v54  ;;  %v826_v63 = vsel %vm636_vm10, %v823_v56, %v825_v55 }
 0x566   :  { %v1502_v60 = vpack.i.bf16 %v812_v59, %v810_v57  ;;  %v1507_v0 = vpack.i.bf16 %v826_v63, %v824_v62 }
 0x568   :  { %1503 = vrot.lane.b32.xlu0 %v1502_v60, %s1587_s4 }
 0x569   :  { %831 = vrot.lane.b32.xlu1 %v825_v55, %s1588_s15 }
 0x56c   :  { %1508 = vrot.lane.b32.xlu0 %v1507_v0, %s1588_s15 }
 0x56d   :  { %935 = vperm.xlu1 %1513, %v1731_v42  }
 0x570   :  { %931 = vperm.xlu0 %1512, %v1726_v41  }
 0x571   :  { %939 = vperm.xlu1 %1513, %v1721_v40  }
 0x5d7   :  { %v818_v1 = vpop.permute.xlu1 %817 }
 0x5d8   :  { %v838_v8 = vsel %vm433_vm7, %v805_v52, %v818_v1 }
 0x5da   :  { %v1504_v2 = vpop.permute.xlu0 %1503 }
 0x5db   :  { %v1506_v3 = vunpack.i.h.bf16 %v1504_v2  ;;  %v1505_v4 = vunpack.i.l.bf16 %v1504_v2  ;;  %v832_v6 = vpop.permute.xlu1 %831 }
 0x5dc   :  { %v841_v42 = vsel %vm437_vm8, %v838_v8, %v832_v6 }
 0x5dd   :  { %v837_v13 = vsel %vm433_vm7, %v798_v49, %v1506_v3  ;;  %v836_v14 = vsel %vm433_vm7, %v804_v47, %v1505_v4  ;;  %v843_v16 = vpack.c.bf16 %v841_v42, %v841_v42 }
 0x5de   :  { %v1509_v7 = vpop.permute.xlu0 %1508 }
 0x5df   :  { %v1511_v9 = vunpack.i.h.bf16 %v1509_v7  ;;  %v1510_v10 = vunpack.i.l.bf16 %v1509_v7 }
 0x5e1   :  { %v839_v41 = vsel %vm437_vm8, %v836_v14, %v1510_v10  ;;  %v840_v40 = vsel %vm437_vm8, %v837_v13, %v1511_v9 }
 0x5e2   :  { %v842_v15 = vpack.c.bf16 %v840_v40, %v839_v41 }
 0x5e4   :  { %1415 = vmatprep.mubr.msk.bf16.mxu1 %vm467_vm9, %v842_v15 }
 0x5e5   :  { %1416 = vmatmul.mubr.msk.bf16.vlgmr.msra.gmra.mxu1 %vm467_vm9, %v843_v16 }
 0x5e6   :  { %1430 = vmatpush3.bf16.msra.mxu1 %v1765_v27 }
 0x5e7   :  { %1431 = vmatprep.subr.bf16.mxu1 %v1775_v34 }
 0x5e8   :  { %v1954_v28 = vpop.permute.xlu1 %935 }
 0x5ea   :  { %1432 = vmatpush3.bf16.msra.mxu1 %v1775_v34 }
 0x5eb   :  { %1433 = vmatprep.subr.bf16.mxu1 %v1785_v39 }
 0x5ec   :  { %v940_v37 = vpop.permute.xlu1 %939 }
 0x5ee   :  { %1434 = vmatpush3.bf16.msra.mxu1 %v1785_v39 }
 0x6a5   :  { %v1417_v19 = vpop.f32.mrf.mxu1 }
 0x6a6   :  { %v893_v20 = vadd.f32 %v1417_v19, %v1821_v12 }
 0x6a7   :  { %v884_v21 = vpop.f32.mrf.mxu1 }
 0x6a8   :  { %v900_v22 = vmul.f32 %v893_v20, %v1865_v5  ;;  %v885_v23 = vadd.f32 %v1821_v12, %v884_v21 }
 0x6a9   :  { %v1418_v27 = vpop.f32.mrf.mxu1 }
 0x6aa   :  { %v903_v24 = vadd.f32 %v900_v22, %v1870_v11  ;;  %v898_v34 = vmul.f32 %v885_v23, %v1876_v38 }
 0x6ab   :  { %v887_v25 = vpop.f32.mrf.mxu1 }
 0x6ac   :  { %v904_v26 = vsel %vm636_vm10, %v903_v24, 0.0  ;;  %v888_v39 = vadd.f32 %v1821_v12, %v887_v25  ;;  %v901_v30 = vadd.f32 %v898_v34, %v1880_v44 }
 0x6ad   :  { %v911_v29 = vrot.slane %v904_v26, 2  ;;  %v922_v5 = vrot.slane %v904_v26, 4 }
 0x6ae   :  { %v899_v31 = vmul.f32 %v888_v39, %v1873_v35  ;;  %v908_v11 = vrot.slane %v901_v30, 2  ;;  %v919_v43 = vrot.slane %v901_v30, 4  ;;  %v1962_v35 = vpop.permute.xlu0 %931 }
 0x6af   :  { %v918_v32 = vmax.f32 %v904_v26, %v911_v29 }
 0x6b0   :  { %v902_v33 = vadd.f32 %v899_v31, %v1883_v45 }
 0x6b1   :  { %v929_v18 = vmax.f32 %v918_v32, %v922_v5 }
 0x6b2   :  { %v909_v36 = vrot.slane %v902_v33, 2  ;;  %v920_v38 = vrot.slane %v902_v33, 4 }
 0x6b3   :  { %v944_v49 = vmul.f32 %v940_v37, %v929_v18 }
 0x6b4   :  { %v912_v46 = vsel %vm76_vm3, %v909_v36, %v911_v29  ;;  %v910_v47 = vsel %vm76_vm3, %v908_v11, %v909_v36  ;;  %v923_v44 = vsel %vm636_vm10, %v920_v38, %v922_v5  ;;  %v921_v51 = vsel %vm636_vm10, %v919_v43, %v920_v38 }
 0x6b5   :  { %v917_v48 = vmax.f32 %v902_v33, %v912_v46  ;;  %v916_v50 = vmax.f32 %v901_v30, %v910_v47  ;;  %v947_v54 = vmax.f32 %v944_v49, 0.0 }
 0x6b7   :  { %v928_v45 = vmax.f32 %v917_v48, %v923_v44  ;;  %v927_v52 = vmax.f32 %v916_v50, %v921_v51  ;;  %v954_v59 = vrot.slane %v947_v54, 4 }
 0x6b9   :  { %v1966_v53 = vmul.f32 %v1954_v28, %v928_v45  ;;  %v1969_v55 = vmul.f32 %v1962_v35, %v927_v52 }
 0x6bb   :  { %v946_v56 = vmax.f32 %v1966_v53, 0.0  ;;  %v945_v57 = vmax.f32 %v1969_v55, 0.0 }
 0x6bd   :  { %v952_v58 = vrot.slane %v946_v56, 4  ;;  %v951_v60 = vrot.slane %v945_v57, 4 }
 0x6bf   :  { %v953_v61 = vsel %vm636_vm10, %v951_v60, %v952_v58  ;;  %v959_v62 = vsel %vm636_vm10, 0.0, %v951_v60  ;;  %v955_v63 = vsel %vm636_vm10, %v952_v58, %v954_v59 }
 0x6c0   :  { %v961_v0 = vrot.slane %v959_v62, 4  ;;  %v964_v1 = vrot.slane %v955_v63, 4  ;;  %v962_v2 = vrot.slane %v953_v61, 4  ;;  %v1519_v7 = vpack.i.bf16 %v955_v63, %v953_v61 }
 0x6c2   :  { %970 = vrot.lane.b32.xlu1 %v964_v1, %s1587_s4  ;;  %v963_v3 = vsel %vm636_vm10, %v961_v0, %v962_v2  ;;  %v965_v4 = vsel %vm636_vm10, %v962_v2, %v964_v1 }
 0x6c3   :  { %v1514_v6 = vpack.i.bf16 %v965_v4, %v963_v3 }
 0x6c5   :  { %1515 = vrot.lane.b32.xlu0 %v1514_v6, %s1587_s4 }
 0x6c6   :  { %980 = vrot.lane.b32.xlu1 %v1591_v17, %s1588_s15 }
 0x6c9   :  { %1520 = vrot.lane.b32.xlu0 %v1519_v7, %s1588_s15  ;;  %v1556_v7 = vld [vmem:[%s2045_s6 + $0x8] sm:$0xff]  }
 0x734   :  { %v971_v8 = vpop.permute.xlu1 %970 }
 0x735   :  { %v987_v41 = vsel %vm433_vm7, %v955_v63, %v971_v8  ;;  %v1557_v8 = vld [vmem:[%s2045_s6] sm:$0xff]  }
 0x737   :  { %v1516_v9 = vpop.permute.xlu0 %1515 }
 0x738   :  { %v1518_v10 = vunpack.i.h.bf16 %v1516_v9  ;;  %v1517_v13 = vunpack.i.l.bf16 %v1516_v9  ;;  %v981_v14 = vpop.permute.xlu1 %980 }
 0x739   :  { %v990_v20 = vsel %vm437_vm8, %v987_v41, %v981_v14 }
 0x73a   :  { %v986_v16 = vsel %vm433_vm7, %v953_v61, %v1518_v10  ;;  %v985_v19 = vsel %vm433_vm7, %v959_v62, %v1517_v13  ;;  %v992_v27 = vpack.c.bf16 %v990_v20, %v990_v20 }
 0x73b   :  { %v1521_v42 = vpop.permute.xlu0 %1520 }
 0x73c   :  { %v1523_v40 = vunpack.i.h.bf16 %v1521_v42  ;;  %v1522_v15 = vunpack.i.l.bf16 %v1521_v42 }
 0x73e   :  { %v988_v21 = vsel %vm437_vm8, %v985_v19, %v1522_v15  ;;  %v989_v22 = vsel %vm437_vm8, %v986_v16, %v1523_v40 }
 0x73f   :  { %v991_v23 = vpack.c.bf16 %v989_v22, %v988_v21 }
 0x741   :  { %1425 = vmatprep.mubr.msk.bf16.mxu0 %vm467_vm9, %v991_v23 }
 0x742   :  { %1426 = vmatmul.mubr.msk.bf16.vlgmr.msra.gmra.mxu0 %vm467_vm9, %v992_v27 }
 0x743   :  { %1440 = vmatpush3.bf16.msra.mxu0 %v1556_v7  ;;  %1443 = vmatprep.mubr.msk.bf16.mxu0 %vm1592_vm12, %v1591_v17 }
 0x744   :  { %1441 = vmatprep.subr.bf16.mxu0 %v1591_v17 }
 0x747   :  { %1442 = vmatpush3.bf16.msra.mxu0 %v1557_v8 }
 0x802   :  { %v1427_v24 = vpop.f32.mrf.mxu0 }
 0x803   :  { %v1042_v34 = vadd.f32 %v1427_v24, %v1821_v12 }
 0x804   :  { %v1033_v25 = vpop.f32.mrf.mxu0 }
 0x805   :  { %v1034_v26 = vadd.f32 %v1821_v12, %v1033_v25  ;;  %v1049_v29 = vmul.f32 %v1042_v34, %v940_v37 }
 0x806   :  { %v1428_v39 = vpop.f32.mrf.mxu0 }
 0x807   :  { %v1047_v30 = vmul.f32 %v1034_v26, %v1962_v35  ;;  %v1052_v33 = vmax.f32 %v1049_v29, 0.0 }
 0x808   :  { %v1036_v31 = vpop.f32.mrf.mxu0 }
 0x809   :  { %v1050_v5 = vmax.f32 %v1047_v30, 0.0  ;;  %v1037_v32 = vadd.f32 %v1821_v12, %v1036_v31  ;;  %v1059_v38 = vrot.slane %v1052_v33, 4 }
 0x80b   :  { %v1056_v18 = vrot.slane %v1050_v5, 4  ;;  %v1048_v11 = vmul.f32 %v1037_v32, %v1954_v28 }
 0x80d   :  { %v1051_v36 = vmax.f32 %v1048_v11, 0.0  ;;  %v1064_v43 = vsel %vm636_vm10, 0.0, %v1056_v18 }
 0x80e   :  { %v1066_v37 = vrot.slane %v1064_v43, 4 }
 0x80f   :  { %v1057_v46 = vrot.slane %v1051_v36, 4 }
 0x811   :  { %v1058_v47 = vsel %vm636_vm10, %v1056_v18, %v1057_v46  ;;  %v1060_v48 = vsel %vm636_vm10, %v1057_v46, %v1059_v38 }
 0x812   :  { %v1069_v49 = vrot.slane %v1060_v48, 4  ;;  %v1067_v50 = vrot.slane %v1058_v47, 4  ;;  %v1529_v52 = vpack.i.bf16 %v1060_v48, %v1058_v47 }
 0x814   :  { %1075 = vrot.lane.b32.xlu1 %v1069_v49, %s1587_s4  ;;  %v1068_v44 = vsel %vm636_vm10, %v1066_v37, %v1067_v50  ;;  %v1070_v51 = vsel %vm636_vm10, %v1067_v50, %v1069_v49 }
 0x815   :  { %v1524_v45 = vpack.i.bf16 %v1070_v51, %v1068_v44 }
 0x817   :  { %1525 = vrot.lane.b32.xlu0 %v1524_v45, %s1587_s4 }
 0x81b   :  { %1530 = vrot.lane.b32.xlu0 %v1529_v52, %s1588_s15 }
 0x886   :  { %v1076_v54 = vpop.permute.xlu1 %1075 }
 0x887   :  { %v1088_v59 = vsel %vm433_vm7, %v1060_v48, %v1076_v54 }
 0x888   :  { %v1091_v63 = vsel %vm437_vm8, %v1088_v59, %v981_v14 }
 0x889   :  { %v1526_v56 = vpop.permute.xlu0 %1525  ;;  %v1093_v6 = vpack.c.bf16 %v1091_v63, %v1091_v63 }
 0x88a   :  { %v1528_v57 = vunpack.i.h.bf16 %v1526_v56  ;;  %v1527_v58 = vunpack.i.l.bf16 %v1526_v56 }
 0x88c   :  { %v1087_v0 = vsel %vm433_vm7, %v1058_v47, %v1528_v57  ;;  %v1086_v1 = vsel %vm433_vm7, %v1064_v43, %v1527_v58 }
 0x88d   :  { %v1531_v60 = vpop.permute.xlu0 %1530 }
 0x88e   :  { %v1533_v61 = vunpack.i.h.bf16 %v1531_v60  ;;  %v1532_v62 = vunpack.i.l.bf16 %v1531_v60 }
 0x890   :  { %v1089_v2 = vsel %vm437_vm8, %v1086_v1, %v1532_v62  ;;  %v1090_v3 = vsel %vm437_vm8, %v1087_v0, %v1533_v61 }
 0x891   :  { %v1092_v4 = vpack.c.bf16 %v1090_v3, %v1089_v2 }
 0x893   :  { %1435 = vmatprep.mubr.msk.bf16.mxu1 %vm467_vm9, %v1092_v4 }
 0x894   :  { %1436 = vmatmul.mubr.msk.bf16.vlgmr.msra.gmra.mxu1 %vm467_vm9, %v1093_v6 }
 0x954   :  { %v1437_v9 = vpop.f32.mrf.mxu1 }
 0x956   :  { %v1134_v10 = vpop.f32.mrf.mxu1 }
 0x957   :  { %v1135_v13 = vadd.f32 %v1821_v12, %v1134_v10 }
 0x958   :  { %v1438_v14 = vpop.f32.mrf.mxu1 }
 0x959   :  { %v1147_v42 = vmul.f32 %v1135_v13, %v1962_v35 }
 0x95a   :  { %v1137_v41 = vpop.f32.mrf.mxu1 }
 0x95b   :  { %v1138_v40 = vadd.f32 %v1821_v12, %v1137_v41  ;;  %v1149_v15 = vadd.f32 %v1147_v42, %v1969_v55 }
 0x95d   :  { %v1148_v16 = vmul.f32 %v1138_v40, %v1954_v28  ;;  %v1152_v20 = vrot.slane %v1149_v15, 1  ;;  %v1158_v22 = vrot.slane %v1149_v15, 5  ;;  %v1299_v28 = vld [vmem:[%s2046_s7] ss:$0 sm:$0xff]  ;;  %s1253_s7 = sshll.u32 %s1593_s22, 4  ;;  %s1254_s7 = int_to_ptr.vmem [resolvable:$true] %s1253_s7 }
 0x95e   :  { %s1562_s23 = scalar_lea.vmem %s1254_s7, 32  ;;  %p1567_p1 = scmp.lt.s32.totalorder %s1254_s7, %s1254_s7 }
 0x95f   :  { %v1150_v19 = vadd.f32 %v1148_v16, %v1966_v53  ;;  %p1563_p0 = scmp.ne.s32.totalorder %s1254_s7, %s1562_s23  ;;  %p1568_p2 = scmp.lt.s32.totalorder %s1562_s23, %s1562_s23 }
 0x961   :  { %v1155_v21 = vrot.slane %v1150_v19, 2  ;;  %v1160_v23 = vrot.slane %v1150_v19, 6  ;;  %p1569_p3 = por %p1568_p2, %p1567_p1 }
 0x963   :  { %v1162_v27 = vsel %vm47_vm0, %v1158_v22, %v1160_v23  ;;  %v1157_v35 = vsel %vm47_vm0, %v1152_v20, %v1155_v21  ;;  %p1570_p4 = pnand %p1569_p3, %p1563_p0 }
 0x964   :  { %1164 = vrot.lane.b32.xlu1 %v1162_v27, %s1587_s4 }
 0x9d6   :  { %v1165_v17 = vpop.permute.xlu1 %1164 }
 0x9d7   :  { %v1167_v24 = vsel %vm433_vm7, %v1157_v35, %v1165_v17 }
 0x9d8   :  { %v1168_v12 = vpack.c.bf16 %v1167_v24, %v1167_v24 }
 0x9da   :  { %1444 = vmatmul.mubr.msk.bf16.vlgmr.msra.gmra.mxu0 %vm437_vm8, %v1168_v12 }
 0xa9a   :  { %v1229_v53 = vpop.f32.mrf.mxu0 }
 0xa9b   :  { %v1230_v55 = vadd.f32 %v1299_v28, %v1229_v53 }
 0xa9c   :  { %v1445_v34 = vpop.f32.mrf.mxu0 }
 0xa9d   :  { %v1235_v25 = vsel %vm684_vm11, %v1230_v55, -inf }
 0xa9e   :  { %1236 = vmax.xlane.f32.xlu0 %v1235_v25  ;;  %v1232_v26 = vpop.f32.mrf.mxu0 }
 0xaa0   :  { %v1446_v39 = vpop.f32.mrf.mxu0 }
 0xb27   :  { %v1237_v29 = vpop.xlane.xlu0 %1236 }
 0xb28   :  { %v1238_v30 = vsub.f32 %v1230_v55, %v1237_v29 }
 0xb2a   :  { %v1239_v31 = vmul.f32 1.442695, %v1238_v30 }
 0xb2c   :  { %1558 = vpow2.f32 %v1239_v31 }
 0xb39   :  { %v1559_v5 = vpop.eup %1558 }
 0xb3a   :  { %v1241_v32 = vsel %vm684_vm11, %v1559_v5, 0.0 }
 0xb3b   :  { %1242 = vadd.xlane.f32.xlu1 %v1241_v32 }
 0xbc4   :  { %v1243_v33 = vpop.xlane.xlu1 %1242 }
 0xbc5   :  { %1560 = vrcp.f32 %v1243_v33 }
 0xbd2   :  { %v1561_v18 = vpop.eup %1560 }
 0xbd3   :  { %v1245_v11 = vmul.f32 %v1561_v18, %v1559_v5 }
 0xbd5   :  { %1246 = vst [vmem:[#allocation2] sm:$0x3] %v1245_v11 }
 0xbd6   :  { %1573 = shalt.err (!%p1570_p4)
}
 0xbd7   :  { %1256 = dma.vmem_to_hbm [thread:$0]  %s1254_s7, 32, %s2047_s8, [#allocation3]  }
 0xbd8   :  { %1582 = dma.done.wait [#allocation3], 32  }
 0xbd9   :  { %1583 = vsyncadd [#allocation3], 4294967264 }
 0xbda   :  { %1260 = vsyncpa [#allocation3], 1 }

</bundles_post_ra>
